<compile_context>
chip_gen: v5e
topology: v5e:2x2
jax: 0.10.0
libtpu: 0.0.40
codegen_flags: <defaults>
</compile_context>

<pallas_src>
import functools

import numpy as np
import jax
import jax.numpy as jnp
from jax import lax
from jax.experimental import pallas as pl
from jax.experimental.pallas import tpu as pltpu


def _pad_to(n, m):
    return (n + m - 1) // m * m


def mapping_kernel(z_ref, w_ref, b_ref, o_ref, *, num_layers, inv_zdim):
    """One batch tile per grid step.

    z_ref : (block_m, F_pad)            f32  zero-padded latent tile
    w_ref : (num_layers, F_pad, F_pad)  bf16 pre-transposed (in, out) weights,
                                        weight_gain folded in, zero-padded,
                                        grid-invariant (constant index map)
    b_ref : (num_layers, 1, F_pad)      f32  biases, bias_gain folded in,
                                        zero-padded, grid-invariant
    o_ref : (block_m, F_pad)            f32  output tile
    """
    x = z_ref[...].astype(jnp.float32)
    # normalize_2nd_moment over the TRUE feature count (padding lanes are 0,
    # so the sum is exact; dividing by the real z_dim gives the true mean).
    x = x * lax.rsqrt(jnp.sum(x * x, axis=-1, keepdims=True) * inv_zdim + 1e-8)

    # num_layers fully connected layers, unrolled at trace time. Each is one
    # lane-dense bf16 MXU matmul with f32 accumulation + bias + leaky_relu(0.2).
    for i in range(num_layers):
        w = w_ref[i]                      # (F_pad, F_pad) bf16, static index
        b = b_ref[i]                      # (1, F_pad)     f32
        y = jnp.dot(x.astype(jnp.bfloat16), w,
                    preferred_element_type=jnp.float32) + b
        x = jnp.maximum(y, 0.2 * y)       # leaky_relu(0.2)

    o_ref[...] = x.astype(o_ref.dtype)


def pack_mapping_params(weights, biases, *, z_dim, lr_multiplier=0.01):
    """One-time (hoisted) parameter prep.

    weights[i]: [out_i, in_i], biases[i]: [out_i] (as stored by the PyTorch
    module, i.e. weight = randn([out,in]) / lr_multiplier).

    Returns:
      w_stack: (L, F_pad, F_pad) bf16 -- transposed to (in, out), weight_gain
               (= lr_multiplier / sqrt(in)) folded in, zero padded.
      b_stack: (L, 1, F_pad) f32 -- bias_gain (= lr_multiplier) folded in.
    """
    num_layers = len(weights)
    feats = [z_dim] + [int(w.shape[0]) for w in weights]
    f_pad = max(_pad_to(f, 128) for f in feats)

    w_stack = np.zeros((num_layers, f_pad, f_pad), np.float32)
    b_stack = np.zeros((num_layers, 1, f_pad), np.float32)
    for i in range(num_layers):
        fin, fout = feats[i], feats[i + 1]
        wgain = np.float32(lr_multiplier) / np.sqrt(np.float32(fin))
        w_stack[i, :fin, :fout] = np.asarray(weights[i], np.float32).T * wgain
        b_stack[i, 0, :fout] = (np.asarray(biases[i], np.float32)
                                * np.float32(lr_multiplier))
    return jnp.asarray(w_stack, jnp.bfloat16), jnp.asarray(b_stack, jnp.float32)


@functools.partial(jax.jit,
                   static_argnames=("z_dim", "w_dim", "num_ws", "block_m"))
def mapping_network_forward(z, w_stack, b_stack, *, z_dim, w_dim, num_ws,
                            block_m=None):
    """z: [B, z_dim] (extra singleton dims tolerated, like torch .squeeze()).

    Returns [B, num_ws, w_dim] (or [B, w_dim] if num_ws is None), matching the
    PyTorch MappingNetwork.forward with default truncation/skip settings.
    """
    B = z.shape[0]
    z = z.reshape(B, -1).astype(jnp.float32)
    num_layers, f_pad, _ = w_stack.shape

    # Batch tiling: whole batch in one step when small; 256-row "parallel"
    # tiles for large batches (keeps >=2 grid steps so both v7x TCs get work).
    if block_m is None:
        block_m = _pad_to(B, 8) if B <= 256 else 256
    b_pad = _pad_to(B, block_m)

    zp = jnp.zeros((b_pad, f_pad), jnp.float32).at[:B, :z_dim].set(z)

    out = pl.pallas_call(
        functools.partial(mapping_kernel, num_layers=num_layers,
                          inv_zdim=float(1.0 / z_dim)),
        out_shape=jax.ShapeDtypeStruct((b_pad, f_pad), jnp.float32),
        grid_spec=pltpu.PrefetchScalarGridSpec(
            num_scalar_prefetch=0,
            grid=(b_pad // block_m,),
            in_specs=[
                pl.BlockSpec((block_m, f_pad), lambda i: (i, 0)),
                # Packed, grid-invariant weights/biases: constant index maps
                # => DMA'd once, VMEM-resident across all batch tiles.
                pl.BlockSpec((num_layers, f_pad, f_pad), lambda i: (0, 0, 0)),
                pl.BlockSpec((num_layers, 1, f_pad), lambda i: (0, 0, 0)),
            ],
            out_specs=pl.BlockSpec((block_m, f_pad), lambda i: (i, 0)),
        ),
        compiler_params=pltpu.CompilerParams(
            dimension_semantics=("parallel",)),
    )(zp, w_stack, b_stack)

    x = out[:B, :w_dim]
    if num_ws is not None:
        # "broadcast": x.unsqueeze(1).repeat([1, num_ws, 1]) -- pure layout.
        x = jnp.broadcast_to(x[:, None, :], (B, num_ws, w_dim))
    # TODO(synk): truncation (truncation_psi != 1) and the training-only w_avg
    # EMA update are not lowered; forward defaults make both identity/no-op.
    return x


def reference_forward(z, weights, biases, *, num_ws, lr_multiplier=0.01):
    """Pure-JAX f32/HIGHEST reference of the PyTorch MappingNetwork.forward."""
    x = z.astype(jnp.float32)
    x = x * lax.rsqrt(jnp.mean(jnp.square(x), axis=1, keepdims=True) + 1e-8)
    for w, b in zip(weights, biases):
        wgain = np.float32(lr_multiplier) / np.sqrt(np.float32(w.shape[1]))
        y = jnp.dot(x, (w * wgain).T, precision=lax.Precision.HIGHEST)
        y = y + (b * np.float32(lr_multiplier))[None, :]
        x = jnp.where(y >= 0.0, y, 0.2 * y)
    if num_ws is not None:
        x = jnp.broadcast_to(x[:, None, :], (x.shape[0], num_ws, x.shape[1]))
    return x


if __name__ == "__main__":
    B, Z_DIM, W_DIM, NUM_WS, NUM_LAYERS = 32, 64, 64, 8, 8
    LR_MULT = 0.01  # MappingNetwork default

    key = jax.random.PRNGKey(0)
    keys = jax.random.split(key, 2 * NUM_LAYERS + 1)

    # features_list = [z_dim] + [layer_features]*(num_layers-1) + [w_dim],
    # layer_features=None -> w_dim.
    feats = [Z_DIM] + [W_DIM] * NUM_LAYERS

    weights, biases = [], []
    for i in range(NUM_LAYERS):
        # FullyConnectedLayer init: weight = randn([out, in]) / lr_multiplier.
        weights.append(jax.random.normal(keys[i], (feats[i + 1], feats[i]),
                                         jnp.float32) / np.float32(LR_MULT))
        # bias_init=0 in the module; use small nonzero deterministic biases so
        # the bias + bias_gain path is actually exercised.
        biases.append(0.1 * jax.random.normal(keys[NUM_LAYERS + i],
                                              (feats[i + 1],), jnp.float32))

    z = jax.random.normal(keys[-1], (B, Z_DIM), jnp.float32)

    # One-time hoisted parameter prep (outside the per-call path).
    w_stack, b_stack = pack_mapping_params(weights, biases, z_dim=Z_DIM,
                                           lr_multiplier=LR_MULT)

    out = mapping_network_forward(z, w_stack, b_stack, z_dim=Z_DIM,
                                  w_dim=W_DIM, num_ws=NUM_WS)
    out = jax.block_until_ready(out)

    ref = reference_forward(z, weights, biases, num_ws=NUM_WS,
                            lr_multiplier=LR_MULT)

    out_np, ref_np = np.asarray(out), np.asarray(ref)
    # Kernel uses bf16 MXU operands (f32 accumulation) over an 8-layer chain;
    # the reference is f32/HIGHEST, so use bf16-appropriate elementwise bounds
    # plus a tight whole-tensor relative check.
    np.testing.assert_allclose(out_np, ref_np, rtol=5e-2, atol=5e-3)
    rel_err = np.linalg.norm(out_np - ref_np) / np.linalg.norm(ref_np)
    assert rel_err < 2e-2, f"relative Frobenius error too large: {rel_err}"

    print("KERNEL_OK")
</pallas_src>

<mosaic_0001>
module attributes {stable_mosaic.version = 11 : i64} {
  func.func @mapping_kernel(%arg0: i32, %arg1: memref<32x128xf32, #tpu.memory_space<vmem>>, %arg2: memref<8x128x128xbf16, #tpu.memory_space<vmem>>, %arg3: memref<8x1x128xf32, #tpu.memory_space<vmem>>, %arg4: memref<32x128xf32, #tpu.memory_space<vmem>>) attributes {dimension_semantics = [#tpu.dimension_semantics<parallel>], iteration_bounds = array<i64: 1>, scalar_prefetch = 0 : i64, scratch_operands = 0 : i64, tpu.core_type = #tpu.core_type<tc>, window_params = [{transform_indices = @transform_0, window_bounds = array<i64: 32, 128>}, {pipeline_mode = #tpu.pipeline_mode<synchronous>, transform_indices = @transform_1, window_bounds = array<i64: 8, 128, 128>}, {pipeline_mode = #tpu.pipeline_mode<synchronous>, transform_indices = @transform_2, window_bounds = array<i64: 8, 1, 128>}, {transform_indices = @transform_3, window_bounds = array<i64: 32, 128>}]} {
    %c0 = arith.constant 0 : index
    %c0_0 = arith.constant 0 : index
    %0 = vector.load %arg1[%c0, %c0_0] : memref<32x128xf32, #tpu.memory_space<vmem>>, vector<32x128xf32>
    %1 = arith.mulf %0, %0 : vector<32x128xf32>
    %cst = arith.constant dense<0.000000e+00> : vector<32xf32>
    %2 = vector.multi_reduction <add>, %1, %cst [1] : vector<32x128xf32> to vector<32xf32>
    %3 = vector.shape_cast %2 : vector<32xf32> to vector<32x1xf32>
    %cst_1 = arith.constant 1.562500e-02 : f32
    %4 = vector.broadcast %cst_1 : f32 to vector<32x1xf32>
    %5 = arith.mulf %3, %4 : vector<32x1xf32>
    %cst_2 = arith.constant 9.99999993E-9 : f32
    %6 = vector.broadcast %cst_2 : f32 to vector<32x1xf32>
    %7 = arith.addf %5, %6 : vector<32x1xf32>
    %8 = math.rsqrt %7 : vector<32x1xf32>
    %9 = vector.broadcast %8 : vector<32x1xf32> to vector<32x128xf32>
    %10 = arith.mulf %0, %9 : vector<32x128xf32>
    %c0_3 = arith.constant 0 : index
    %c0_4 = arith.constant 0 : index
    %c0_5 = arith.constant 0 : index
    %11 = vector.load %arg2[%c0_3, %c0_4, %c0_5] : memref<8x128x128xbf16, #tpu.memory_space<vmem>>, vector<1x128x128xbf16>
    %12 = vector.shape_cast %11 : vector<1x128x128xbf16> to vector<128x128xbf16>
    %c0_6 = arith.constant 0 : index
    %c0_7 = arith.constant 0 : index
    %c0_8 = arith.constant 0 : index
    %13 = vector.load %arg3[%c0_6, %c0_7, %c0_8] : memref<8x1x128xf32, #tpu.memory_space<vmem>>, vector<1x1x128xf32>
    %14 = vector.shape_cast %13 : vector<1x1x128xf32> to vector<1x128xf32>
    %15 = arith.truncf %10 : vector<32x128xf32> to vector<32x128xbf16>
    %cst_9 = arith.constant dense<0.000000e+00> : vector<32x128xf32>
    %16 = tpu.matmul %15, %12, %cst_9 {dimension_numbers = #tpu.dot_dimension_numbers<[1], [0], [0], [1], [0, 0, 1, 1], [], []>} : vector<32x128xbf16>, vector<128x128xbf16>, vector<32x128xf32> -> vector<32x128xf32>
    %17 = vector.broadcast %14 : vector<1x128xf32> to vector<32x128xf32>
    %18 = arith.addf %16, %17 : vector<32x128xf32>
    %cst_10 = arith.constant 2.000000e-01 : f32
    %19 = vector.broadcast %cst_10 : f32 to vector<32x128xf32>
    %20 = arith.mulf %19, %18 : vector<32x128xf32>
    %21 = arith.maximumf %18, %20 : vector<32x128xf32>
    %c1 = arith.constant 1 : index
    %c0_11 = arith.constant 0 : index
    %c0_12 = arith.constant 0 : index
    %22 = vector.load %arg2[%c1, %c0_11, %c0_12] : memref<8x128x128xbf16, #tpu.memory_space<vmem>>, vector<1x128x128xbf16>
    %23 = vector.shape_cast %22 : vector<1x128x128xbf16> to vector<128x128xbf16>
    %c1_13 = arith.constant 1 : index
    %c0_14 = arith.constant 0 : index
    %c0_15 = arith.constant 0 : index
    %24 = vector.load %arg3[%c1_13, %c0_14, %c0_15] : memref<8x1x128xf32, #tpu.memory_space<vmem>>, vector<1x1x128xf32>
    %25 = vector.shape_cast %24 : vector<1x1x128xf32> to vector<1x128xf32>
    %26 = arith.truncf %21 : vector<32x128xf32> to vector<32x128xbf16>
    %cst_16 = arith.constant dense<0.000000e+00> : vector<32x128xf32>
    %27 = tpu.matmul %26, %23, %cst_16 {dimension_numbers = #tpu.dot_dimension_numbers<[1], [0], [0], [1], [0, 0, 1, 1], [], []>} : vector<32x128xbf16>, vector<128x128xbf16>, vector<32x128xf32> -> vector<32x128xf32>
    %28 = vector.broadcast %25 : vector<1x128xf32> to vector<32x128xf32>
    %29 = arith.addf %27, %28 : vector<32x128xf32>
    %cst_17 = arith.constant 2.000000e-01 : f32
    %30 = vector.broadcast %cst_17 : f32 to vector<32x128xf32>
    %31 = arith.mulf %30, %29 : vector<32x128xf32>
    %32 = arith.maximumf %29, %31 : vector<32x128xf32>
    %c2 = arith.constant 2 : index
    %c0_18 = arith.constant 0 : index
    %c0_19 = arith.constant 0 : index
    %33 = vector.load %arg2[%c2, %c0_18, %c0_19] : memref<8x128x128xbf16, #tpu.memory_space<vmem>>, vector<1x128x128xbf16>
    %34 = vector.shape_cast %33 : vector<1x128x128xbf16> to vector<128x128xbf16>
    %c2_20 = arith.constant 2 : index
    %c0_21 = arith.constant 0 : index
    %c0_22 = arith.constant 0 : index
    %35 = vector.load %arg3[%c2_20, %c0_21, %c0_22] : memref<8x1x128xf32, #tpu.memory_space<vmem>>, vector<1x1x128xf32>
    %36 = vector.shape_cast %35 : vector<1x1x128xf32> to vector<1x128xf32>
    %37 = arith.truncf %32 : vector<32x128xf32> to vector<32x128xbf16>
    %cst_23 = arith.constant dense<0.000000e+00> : vector<32x128xf32>
    %38 = tpu.matmul %37, %34, %cst_23 {dimension_numbers = #tpu.dot_dimension_numbers<[1], [0], [0], [1], [0, 0, 1, 1], [], []>} : vector<32x128xbf16>, vector<128x128xbf16>, vector<32x128xf32> -> vector<32x128xf32>
    %39 = vector.broadcast %36 : vector<1x128xf32> to vector<32x128xf32>
    %40 = arith.addf %38, %39 : vector<32x128xf32>
    %cst_24 = arith.constant 2.000000e-01 : f32
    %41 = vector.broadcast %cst_24 : f32 to vector<32x128xf32>
    %42 = arith.mulf %41, %40 : vector<32x128xf32>
    %43 = arith.maximumf %40, %42 : vector<32x128xf32>
    %c3 = arith.constant 3 : index
    %c0_25 = arith.constant 0 : index
    %c0_26 = arith.constant 0 : index
    %44 = vector.load %arg2[%c3, %c0_25, %c0_26] : memref<8x128x128xbf16, #tpu.memory_space<vmem>>, vector<1x128x128xbf16>
    %45 = vector.shape_cast %44 : vector<1x128x128xbf16> to vector<128x128xbf16>
    %c3_27 = arith.constant 3 : index
    %c0_28 = arith.constant 0 : index
    %c0_29 = arith.constant 0 : index
    %46 = vector.load %arg3[%c3_27, %c0_28, %c0_29] : memref<8x1x128xf32, #tpu.memory_space<vmem>>, vector<1x1x128xf32>
    %47 = vector.shape_cast %46 : vector<1x1x128xf32> to vector<1x128xf32>
    %48 = arith.truncf %43 : vector<32x128xf32> to vector<32x128xbf16>
    %cst_30 = arith.constant dense<0.000000e+00> : vector<32x128xf32>
    %49 = tpu.matmul %48, %45, %cst_30 {dimension_numbers = #tpu.dot_dimension_numbers<[1], [0], [0], [1], [0, 0, 1, 1], [], []>} : vector<32x128xbf16>, vector<128x128xbf16>, vector<32x128xf32> -> vector<32x128xf32>
    %50 = vector.broadcast %47 : vector<1x128xf32> to vector<32x128xf32>
    %51 = arith.addf %49, %50 : vector<32x128xf32>
    %cst_31 = arith.constant 2.000000e-01 : f32
    %52 = vector.broadcast %cst_31 : f32 to vector<32x128xf32>
    %53 = arith.mulf %52, %51 : vector<32x128xf32>
    %54 = arith.maximumf %51, %53 : vector<32x128xf32>
    %c4 = arith.constant 4 : index
    %c0_32 = arith.constant 0 : index
    %c0_33 = arith.constant 0 : index
    %55 = vector.load %arg2[%c4, %c0_32, %c0_33] : memref<8x128x128xbf16, #tpu.memory_space<vmem>>, vector<1x128x128xbf16>
    %56 = vector.shape_cast %55 : vector<1x128x128xbf16> to vector<128x128xbf16>
    %c4_34 = arith.constant 4 : index
    %c0_35 = arith.constant 0 : index
    %c0_36 = arith.constant 0 : index
    %57 = vector.load %arg3[%c4_34, %c0_35, %c0_36] : memref<8x1x128xf32, #tpu.memory_space<vmem>>, vector<1x1x128xf32>
    %58 = vector.shape_cast %57 : vector<1x1x128xf32> to vector<1x128xf32>
    %59 = arith.truncf %54 : vector<32x128xf32> to vector<32x128xbf16>
    %cst_37 = arith.constant dense<0.000000e+00> : vector<32x128xf32>
    %60 = tpu.matmul %59, %56, %cst_37 {dimension_numbers = #tpu.dot_dimension_numbers<[1], [0], [0], [1], [0, 0, 1, 1], [], []>} : vector<32x128xbf16>, vector<128x128xbf16>, vector<32x128xf32> -> vector<32x128xf32>
    %61 = vector.broadcast %58 : vector<1x128xf32> to vector<32x128xf32>
    %62 = arith.addf %60, %61 : vector<32x128xf32>
    %cst_38 = arith.constant 2.000000e-01 : f32
    %63 = vector.broadcast %cst_38 : f32 to vector<32x128xf32>
    %64 = arith.mulf %63, %62 : vector<32x128xf32>
    %65 = arith.maximumf %62, %64 : vector<32x128xf32>
    %c5 = arith.constant 5 : index
    %c0_39 = arith.constant 0 : index
    %c0_40 = arith.constant 0 : index
    %66 = vector.load %arg2[%c5, %c0_39, %c0_40] : memref<8x128x128xbf16, #tpu.memory_space<vmem>>, vector<1x128x128xbf16>
    %67 = vector.shape_cast %66 : vector<1x128x128xbf16> to vector<128x128xbf16>
    %c5_41 = arith.constant 5 : index
    %c0_42 = arith.constant 0 : index
    %c0_43 = arith.constant 0 : index
    %68 = vector.load %arg3[%c5_41, %c0_42, %c0_43] : memref<8x1x128xf32, #tpu.memory_space<vmem>>, vector<1x1x128xf32>
    %69 = vector.shape_cast %68 : vector<1x1x128xf32> to vector<1x128xf32>
    %70 = arith.truncf %65 : vector<32x128xf32> to vector<32x128xbf16>
    %cst_44 = arith.constant dense<0.000000e+00> : vector<32x128xf32>
    %71 = tpu.matmul %70, %67, %cst_44 {dimension_numbers = #tpu.dot_dimension_numbers<[1], [0], [0], [1], [0, 0, 1, 1], [], []>} : vector<32x128xbf16>, vector<128x128xbf16>, vector<32x128xf32> -> vector<32x128xf32>
    %72 = vector.broadcast %69 : vector<1x128xf32> to vector<32x128xf32>
    %73 = arith.addf %71, %72 : vector<32x128xf32>
    %cst_45 = arith.constant 2.000000e-01 : f32
    %74 = vector.broadcast %cst_45 : f32 to vector<32x128xf32>
    %75 = arith.mulf %74, %73 : vector<32x128xf32>
    %76 = arith.maximumf %73, %75 : vector<32x128xf32>
    %c6 = arith.constant 6 : index
    %c0_46 = arith.constant 0 : index
    %c0_47 = arith.constant 0 : index
    %77 = vector.load %arg2[%c6, %c0_46, %c0_47] : memref<8x128x128xbf16, #tpu.memory_space<vmem>>, vector<1x128x128xbf16>
    %78 = vector.shape_cast %77 : vector<1x128x128xbf16> to vector<128x128xbf16>
    %c6_48 = arith.constant 6 : index
    %c0_49 = arith.constant 0 : index
    %c0_50 = arith.constant 0 : index
    %79 = vector.load %arg3[%c6_48, %c0_49, %c0_50] : memref<8x1x128xf32, #tpu.memory_space<vmem>>, vector<1x1x128xf32>
    %80 = vector.shape_cast %79 : vector<1x1x128xf32> to vector<1x128xf32>
    %81 = arith.truncf %76 : vector<32x128xf32> to vector<32x128xbf16>
    %cst_51 = arith.constant dense<0.000000e+00> : vector<32x128xf32>
    %82 = tpu.matmul %81, %78, %cst_51 {dimension_numbers = #tpu.dot_dimension_numbers<[1], [0], [0], [1], [0, 0, 1, 1], [], []>} : vector<32x128xbf16>, vector<128x128xbf16>, vector<32x128xf32> -> vector<32x128xf32>
    %83 = vector.broadcast %80 : vector<1x128xf32> to vector<32x128xf32>
    %84 = arith.addf %82, %83 : vector<32x128xf32>
    %cst_52 = arith.constant 2.000000e-01 : f32
    %85 = vector.broadcast %cst_52 : f32 to vector<32x128xf32>
    %86 = arith.mulf %85, %84 : vector<32x128xf32>
    %87 = arith.maximumf %84, %86 : vector<32x128xf32>
    %c7 = arith.constant 7 : index
    %c0_53 = arith.constant 0 : index
    %c0_54 = arith.constant 0 : index
    %88 = vector.load %arg2[%c7, %c0_53, %c0_54] : memref<8x128x128xbf16, #tpu.memory_space<vmem>>, vector<1x128x128xbf16>
    %89 = vector.shape_cast %88 : vector<1x128x128xbf16> to vector<128x128xbf16>
    %c7_55 = arith.constant 7 : index
    %c0_56 = arith.constant 0 : index
    %c0_57 = arith.constant 0 : index
    %90 = vector.load %arg3[%c7_55, %c0_56, %c0_57] : memref<8x1x128xf32, #tpu.memory_space<vmem>>, vector<1x1x128xf32>
    %91 = vector.shape_cast %90 : vector<1x1x128xf32> to vector<1x128xf32>
    %92 = arith.truncf %87 : vector<32x128xf32> to vector<32x128xbf16>
    %cst_58 = arith.constant dense<0.000000e+00> : vector<32x128xf32>
    %93 = tpu.matmul %92, %89, %cst_58 {dimension_numbers = #tpu.dot_dimension_numbers<[1], [0], [0], [1], [0, 0, 1, 1], [], []>} : vector<32x128xbf16>, vector<128x128xbf16>, vector<32x128xf32> -> vector<32x128xf32>
    %94 = vector.broadcast %91 : vector<1x128xf32> to vector<32x128xf32>
    %95 = arith.addf %93, %94 : vector<32x128xf32>
    %cst_59 = arith.constant 2.000000e-01 : f32
    %96 = vector.broadcast %cst_59 : f32 to vector<32x128xf32>
    %97 = arith.mulf %96, %95 : vector<32x128xf32>
    %98 = arith.maximumf %95, %97 : vector<32x128xf32>
    %c0_60 = arith.constant 0 : index
    %c0_61 = arith.constant 0 : index
    %99 = vector.load %arg4[%c0_60, %c0_61] : memref<32x128xf32, #tpu.memory_space<vmem>>, vector<32x128xf32>
    tpu.vector_store %arg4[%c0_60, %c0_61], %98 {strides = array<i32>} : memref<32x128xf32, #tpu.memory_space<vmem>>, vector<32x128xf32>,
    return
  }
  func.func @transform_0(%arg0: i32) -> (i32, i32) {
    %c0_i32 = arith.constant 0 : i32
    %c0_i32_0 = arith.constant 0 : i32
    return %arg0, %c0_i32 : i32, i32
  }
  func.func @transform_1(%arg0: i32) -> (i32, i32, i32) {
    %c0_i32 = arith.constant 0 : i32
    %c0_i32_0 = arith.constant 0 : i32
    %c0_i32_1 = arith.constant 0 : i32
    %c0_i32_2 = arith.constant 0 : i32
    return %c0_i32, %c0_i32_0, %c0_i32_1 : i32, i32, i32
  }
  func.func @transform_2(%arg0: i32) -> (i32, i32, i32) {
    %c0_i32 = arith.constant 0 : i32
    %c0_i32_0 = arith.constant 0 : i32
    %c0_i32_1 = arith.constant 0 : i32
    %c0_i32_2 = arith.constant 0 : i32
    return %c0_i32, %c0_i32_0, %c0_i32_1 : i32, i32, i32
  }
  func.func @transform_3(%arg0: i32) -> (i32, i32) {
    %c0_i32 = arith.constant 0 : i32
    %c0_i32_0 = arith.constant 0 : i32
    return %arg0, %c0_i32 : i32, i32
  }
}

</mosaic_0001>

<bundles_post_ra>
// kernel: mapping_network_forward.1
= control target key start
LH: loop header
LB: loop body
LE: loop exit
PB: predicated region body
PF: predicated region fallthrough
CT: control target
= control target key end

     0   :  { %8 = vsyncpa [#allocation3], 0  ;;  %s1269_s15 = smov [#allocation2]   ;;  %s1270_s17 = smov 64   ;;  %s1363_s0 = inlined_call_operand.vmem [shape: f32[32,128], index: 0, kind: input, shape index: {}]   ;;  %s1364_s1 = inlined_call_operand.hbm [shape: bf16[8,128,128], index: 1, kind: input, shape index: {}]   ;;  %s1365_s2 = inlined_call_operand.vmem [shape: f32[8,1,128], index: 2, kind: input, shape index: {}]   ;;  %s1366_s3 = inlined_call_operand.vmem [shape: f32[32,128], index: 3, kind: output, shape index: {}]  }
   0x1   :  { %s15_s14 = sshll.u32 %s1364_s1, 4  ;;  %s17_s16 = sshll.u32 %s1269_s15, 4  ;;  %s16_s14 = int_to_ptr.hbm [resolvable:$true] %s15_s14  ;;  %s18_s16 = int_to_ptr.vmem [resolvable:$true] %s17_s16 }
   0x2   :  { %s1271_s18 = smov 4  }
   0x3   :  { %23 = dma.hbm_to_vmem [thread:$0]  %s16_s14, 8192, %s18_s16, [#allocation3], %s1270_s17, %s1270_s17, %s1271_s18  }
   0x4   :  { %1267 = dma.done.wait [#allocation3], 8192  }
   0x5   :  { %1268 = vsyncadd [#allocation3], 4294959104  ;;  %v1298_v0 = vld [vmem:[%s1363_s0 + $0x10] sm:$0xff]  ;;  %v1303_v1 = vld [vmem:[%s1363_s0] sm:$0xff] }
   0x6   :  { %v36_v2 = vmul.f32 %v1298_v0, %v1298_v0  ;;  %v34_v3 = vmul.f32 %v1303_v1, %v1303_v1  ;;  %v1312_v4 = vld [vmem:[%s1363_s0 + $0x18] sm:$0xff]  ;;  %v1317_v5 = vld [vmem:[%s1363_s0 + $0x8] sm:$0xff]  ;;  %v1166_v9 = vld [vmem:[#allocation2 + $0x30] sm:$0xff] }
   0x7   :  { %v37_v6 = vmul.f32 %v1312_v4, %v1312_v4  ;;  %v35_v7 = vmul.f32 %v1317_v5, %v1317_v5  ;;  %v1167_v8 = vld [vmem:[#allocation2 + $0x38] sm:$0xff]  ;;  %v1165_v10 = vld [vmem:[#allocation2 + $0x28] sm:$0xff]  ;;  %v1164_v11 = vld [vmem:[#allocation2 + $0x20] sm:$0xff] }
   0x8   :  { %42 = vadd.xlane.f32.xlu1 %v36_v2  ;;  %38 = vadd.xlane.f32.xlu0 %v34_v3  ;;  %v1163_v12 = vld [vmem:[#allocation2 + $0x18] sm:$0xff]  ;;  %v1162_v13 = vld [vmem:[#allocation2 + $0x10] sm:$0xff]  ;;  %v1161_v14 = vld [vmem:[#allocation2 + $0x8] sm:$0xff] }
   0x9   :  { %168 = vmatpush.bf16.msra.mxu0 %v1167_v8  ;;  %v1160_v15 = vld [vmem:[#allocation2] sm:$0xff]  ;;  %v1175_v34 = vld [vmem:[#allocation2 + $0x78] sm:$0xff]  ;;  %v1174_v38 = vld [vmem:[#allocation2 + $0x70] sm:$0xff] }
   0xa   :  { %267 = vmatpush.bf16.msra.mxu1 %v1175_v34  ;;  %v1173_v44 = vld [vmem:[#allocation2 + $0x68] sm:$0xff]  ;;  %v1172_v50 = vld [vmem:[#allocation2 + $0x60] sm:$0xff]  ;;  %v1171_v3 = vld [vmem:[#allocation2 + $0x58] sm:$0xff] }
   0xb   :  { %v1228_v34 = vld [vmem:[%s1365_s2 + $0x1] ss:$0 sm:$0xff] }
   0xd   :  { %169 = vmatpush.bf16.msra.mxu0 %v1166_v9  ;;  %v1227_v9 = vld [vmem:[%s1365_s2] ss:$0 sm:$0xff] }
   0xe   :  { %268 = vmatpush.bf16.msra.mxu1 %v1174_v38  ;;  %v1189_v38 = vld [vmem:[#allocation2 + $0xe8] sm:$0xff] }
  0x10   :  { %44 = vadd.xlane.f32.xlu1 %v37_v6  ;;  %40 = vadd.xlane.f32.xlu0 %v35_v7  ;;  %v1169_v6 = vld [vmem:[#allocation2 + $0x48] sm:$0xff]  ;;  %v1168_v7 = vld [vmem:[#allocation2 + $0x40] sm:$0xff] }
  0x11   :  { %170 = vmatpush.bf16.msra.mxu0 %v1165_v10  ;;  %v1183_v10 = vld [vmem:[#allocation2 + $0xb8] sm:$0xff] }
  0x12   :  { %269 = vmatpush.bf16.msra.mxu1 %v1173_v44  ;;  %366 = vmatpush.bf16.msra.mxu2 %v1183_v10 }
  0x15   :  { %171 = vmatpush.bf16.msra.mxu0 %v1164_v11 }
  0x16   :  { %270 = vmatpush.bf16.msra.mxu1 %v1172_v50 }
  0x19   :  { %172 = vmatpush.bf16.msra.mxu0 %v1163_v12 }
  0x1a   :  { %271 = vmatpush.bf16.msra.mxu1 %v1171_v3 }
  0x1d   :  { %173 = vmatpush.bf16.msra.mxu0 %v1162_v13 }
  0x21   :  { %174 = vmatpush.bf16.msra.mxu0 %v1161_v14 }
  0x25   :  { %175 = vmatpush.bf16.msra.mxu0 %v1160_v15 }
  0x7b   :  { %v43_v16 = vpop.xlane.xlu1 %42  ;;  %v39_v17 = vpop.xlane.xlu0 %38 }
  0x7c   :  { %v46_v18 = vmul.f32 0.015625, %v39_v17  ;;  %v48_v20 = vmul.f32 0.015625, %v43_v16  ;;  %v1180_v16 = vld [vmem:[#allocation2 + $0xa0] sm:$0xff] }
  0x7e   :  { %v50_v19 = vadd.f32 1e-08, %v46_v18  ;;  %v52_v28 = vadd.f32 1e-08, %v48_v20 }
  0x80   :  { %1235 = vrsqrt.f32 %v50_v19  ;;  %vm60_vm1 = vweird.f32 %v50_v19  ;;  %vm80_vm8 = vweird.f32 %v52_v28 }
  0x83   :  { %v45_v21 = vpop.xlane.xlu1 %44  ;;  %v41_v22 = vpop.xlane.xlu0 %40 }
  0x84   :  { %v49_v23 = vmul.f32 0.015625, %v45_v21  ;;  %v47_v24 = vmul.f32 0.015625, %v41_v22 }
  0x86   :  { %v53_v25 = vadd.f32 1e-08, %v49_v23  ;;  %v51_v26 = vadd.f32 1e-08, %v47_v24  ;;  %v1236_v27 = vpop.eup %1235 }
  0x87   :  { %v55_v29 = vmul.f32 %v1236_v27, %v50_v19  ;;  %vm61_vm0 = vweird.f32 %v1236_v27 }
  0x88   :  { %1237 = vrsqrt.f32 %v53_v25  ;;  %vm62_vm3 = vmor %vm60_vm1, %vm61_vm0  ;;  %vm70_vm4 = vweird.f32 %v51_v26  ;;  %vm90_vm6 = vweird.f32 %v53_v25 }
  0x89   :  { %1239 = vrsqrt.f32 %v51_v26  ;;  %v56_v30 = vmul.f32 %v1236_v27, %v55_v29  ;;  %v1179_v29 = vld [vmem:[#allocation2 + $0x98] sm:$0xff] }
  0x8a   :  { %1241 = vrsqrt.f32 %v52_v28 }
  0x8b   :  { %v57_v31 = vmul.f32 0.5, %v56_v30  ;;  %v1178_v30 = vld [vmem:[#allocation2 + $0x90] sm:$0xff] }
  0x8d   :  { %v58_v35 = vsub.f32 1.5, %v57_v31  ;;  %v1177_v31 = vld [vmem:[#allocation2 + $0x88] sm:$0xff] }
  0x8e   :  { %v1238_v32 = vpop.eup %1237 }
  0x8f   :  { %v1240_v33 = vpop.eup %1239  ;;  %v85_v39 = vmul.f32 %v1238_v32, %v53_v25  ;;  %v59_v43 = vmul.f32 %v1236_v27, %v58_v35  ;;  %vm91_vm7 = vweird.f32 %v1238_v32  ;;  %v1191_v35 = vld [vmem:[#allocation2 + $0xf8] sm:$0xff] }
  0x90   :  { %v65_v36 = vmul.f32 %v1240_v33, %v51_v26  ;;  %v1242_v37 = vpop.eup %1241  ;;  %vm71_vm2 = vweird.f32 %v1240_v33  ;;  %vm92_vm10 = vmor %vm90_vm6, %vm91_vm7  ;;  %465 = vmatpush.bf16.msra.mxu3 %v1191_v35 }
  0x91   :  { %v75_v41 = vmul.f32 %v1242_v37, %v52_v28  ;;  %v86_v45 = vmul.f32 %v1238_v32, %v85_v39  ;;  %v63_v48 = vsel %vm62_vm3, %v1236_v27, %v59_v43  ;;  %vm72_vm5 = vmor %vm70_vm4, %vm71_vm2  ;;  %vm81_vm9 = vweird.f32 %v1242_v37  ;;  %v1188_v43 = vld [vmem:[#allocation2 + $0xe0] sm:$0xff] }
  0x92   :  { %v66_v40 = vmul.f32 %v1240_v33, %v65_v36  ;;  %v94_v53 = vmul.f32 %v63_v48, %v1303_v1  ;;  %vm82_vm11 = vmor %vm80_vm8, %vm81_vm9  ;;  %v1190_v36 = vld [vmem:[#allocation2 + $0xf0] sm:$0xff] }
  0x93   :  { %v76_v47 = vmul.f32 %v1242_v37, %v75_v41  ;;  %v87_v51 = vmul.f32 0.5, %v86_v45 }
  0x94   :  { %v67_v42 = vmul.f32 0.5, %v66_v40  ;;  %466 = vmatpush.bf16.msra.mxu3 %v1190_v36 }
  0x95   :  { %v77_v55 = vmul.f32 0.5, %v76_v47  ;;  %v88_v57 = vsub.f32 1.5, %v87_v51 }
  0x96   :  { %v68_v46 = vsub.f32 1.5, %v67_v42 }
  0x97   :  { %v78_v58 = vsub.f32 1.5, %v77_v55  ;;  %v89_v59 = vmul.f32 %v1238_v32, %v88_v57  ;;  %v1186_v57 = vld [vmem:[#allocation2 + $0xd0] sm:$0xff] }
  0x98   :  { %v69_v49 = vmul.f32 %v1240_v33, %v68_v46  ;;  %467 = vmatpush.bf16.msra.mxu3 %v1189_v38 }
  0x99   :  { %v79_v60 = vmul.f32 %v1242_v37, %v78_v58  ;;  %v93_v61 = vsel %vm92_vm10, %v1238_v32, %v89_v59  ;;  %v1176_v32 = vld [vmem:[#allocation2 + $0x80] sm:$0xff]  ;;  %v1185_v58 = vld [vmem:[#allocation2 + $0xc8] sm:$0xff] }
  0x9a   :  { %v73_v52 = vsel %vm72_vm5, %v1240_v33, %v69_v49  ;;  %v97_v63 = vmul.f32 %v93_v61, %v1312_v4  ;;  %v1182_v4 = vld [vmem:[#allocation2 + $0xb0] sm:$0xff]  ;;  %v1184_v59 = vld [vmem:[#allocation2 + $0xc0] sm:$0xff] }
  0x9b   :  { %v95_v54 = vmul.f32 %v73_v52, %v1317_v5  ;;  %v83_v62 = vsel %vm82_vm11, %v1242_v37, %v79_v60  ;;  %v1170_v5 = vld [vmem:[#allocation2 + $0x50] sm:$0xff]  ;;  %367 = vmatpush.bf16.msra.mxu2 %v1182_v4  ;;  %v1229_v61 = vld [vmem:[%s1365_s2 + $0x2] ss:$0 sm:$0xff] }
  0x9c   :  { %v96_v1 = vmul.f32 %v83_v62, %v1298_v0  ;;  %272 = vmatpush.bf16.msra.mxu1 %v1170_v5  ;;  %v1181_v0 = vld [vmem:[#allocation2 + $0xa8] sm:$0xff]  ;;  %468 = vmatpush.bf16.msra.mxu3 %v1188_v43  ;;  %v1199_v62 = vld [vmem:[#allocation2 + $0x138] sm:$0xff] }
  0x9d   :  { %v115_v56 = vpack.c.bf16 %v95_v54, %v94_v53  ;;  %564 = vmatpush.bf16.msrb.mxu0 %v1199_v62 }
  0x9e   :  { %v116_v2 = vpack.c.bf16 %v97_v63, %v96_v1  ;;  %v1198_v63 = vld [vmem:[#allocation2 + $0x130] sm:$0xff] }
  0x9f   :  { %176 = vmatmul.bf16.vlgmr.msra.gmra.mxu0 %v115_v56  ;;  %368 = vmatpush.bf16.msra.mxu2 %v1181_v0  ;;  %v1187_v56 = vld [vmem:[#allocation2 + $0xd8] sm:$0xff] }
  0xa0   :  { %273 = vmatpush.bf16.msra.mxu1 %v1169_v6  ;;  %469 = vmatpush.bf16.msra.mxu3 %v1187_v56 }
  0xa1   :  { %565 = vmatpush.bf16.msrb.mxu0 %v1198_v63 }
  0xa3   :  { %369 = vmatpush.bf16.msra.mxu2 %v1180_v16 }
  0xa4   :  { %274 = vmatpush.bf16.msra.mxu1 %v1168_v7  ;;  %470 = vmatpush.bf16.msra.mxu3 %v1186_v57 }
  0xa7   :  { %370 = vmatpush.bf16.msra.mxu2 %v1179_v29 }
  0xa8   :  { %471 = vmatpush.bf16.msra.mxu3 %v1185_v58 }
  0xab   :  { %371 = vmatpush.bf16.msra.mxu2 %v1178_v30 }
  0xac   :  { %472 = vmatpush.bf16.msra.mxu3 %v1184_v59 }
  0xaf   :  { %181 = vmatmul.bf16.gmra.mxu0 %v116_v2  ;;  %372 = vmatpush.bf16.msra.mxu2 %v1177_v31  ;;  %v1197_v2 = vld [vmem:[#allocation2 + $0x128] sm:$0xff] }
  0xb0   :  { %566 = vmatpush.bf16.msrb.mxu0 %v1197_v2 }
  0xb3   :  { %373 = vmatpush.bf16.msra.mxu2 %v1176_v32 }
 0x11c   :  { %v177_v8 = vpop.f32.mrf.mxu0 }
 0x11d   :  { %v178_v11 = vadd.f32 %v1227_v9, %v177_v8  ;;  %v1196_v8 = vld [vmem:[#allocation2 + $0x120] sm:$0xff] }
 0x11e   :  { %567 = vmatpush.bf16.msrb.mxu0 %v1196_v8 }
 0x11f   :  { %v187_v13 = vmul.f32 0.2, %v178_v11 }
 0x121   :  { %v191_v17 = vmax.f32 %v178_v11, %v187_v13 }
 0x124   :  { %v179_v12 = vpop.f32.mrf.mxu0 }
 0x125   :  { %v180_v14 = vadd.f32 %v1227_v9, %v179_v12 }
 0x127   :  { %v188_v15 = vmul.f32 0.2, %v180_v14 }
 0x129   :  { %v192_v18 = vmax.f32 %v180_v14, %v188_v15 }
 0x12b   :  { %v214_v19 = vpack.c.bf16 %v192_v18, %v191_v17 }
 0x12c   :  { %v182_v20 = vpop.f32.mrf.mxu0 }
 0x12d   :  { %275 = vmatmul.bf16.vlgmr.msra.gmra.mxu1 %v214_v19  ;;  %v183_v21 = vadd.f32 %v1227_v9, %v182_v20  ;;  %v1195_v19 = vld [vmem:[#allocation2 + $0x118] sm:$0xff]  ;;  %v1194_v20 = vld [vmem:[#allocation2 + $0x110] sm:$0xff] }
 0x12e   :  { %568 = vmatpush.bf16.msrb.mxu0 %v1195_v19 }
 0x12f   :  { %v189_v23 = vmul.f32 0.2, %v183_v21 }
 0x131   :  { %v193_v26 = vmax.f32 %v183_v21, %v189_v23  ;;  %v1193_v21 = vld [vmem:[#allocation2 + $0x108] sm:$0xff] }
 0x132   :  { %569 = vmatpush.bf16.msrb.mxu0 %v1194_v20 }
 0x134   :  { %v184_v22 = vpop.f32.mrf.mxu0 }
 0x135   :  { %v185_v24 = vadd.f32 %v1227_v9, %v184_v22  ;;  %v1192_v22 = vld [vmem:[#allocation2 + $0x100] sm:$0xff] }
 0x136   :  { %570 = vmatpush.bf16.msrb.mxu0 %v1193_v21 }
 0x137   :  { %v190_v25 = vmul.f32 0.2, %v185_v24 }
 0x139   :  { %v194_v27 = vmax.f32 %v185_v24, %v190_v25  ;;  %v1230_v24 = vld [vmem:[%s1365_s2 + $0x3] ss:$0 sm:$0xff]  ;;  %v1207_v25 = vld [vmem:[#allocation2 + $0x178] sm:$0xff] }
 0x13a   :  { %571 = vmatpush.bf16.msrb.mxu0 %v1192_v22  ;;  %663 = vmatpush.bf16.msrb.mxu1 %v1207_v25 }
 0x13b   :  { %v215_v28 = vpack.c.bf16 %v194_v27, %v193_v26  ;;  %v1206_v26 = vld [vmem:[#allocation2 + $0x170] sm:$0xff] }
 0x13d   :  { %280 = vmatmul.bf16.gmra.mxu1 %v215_v28  ;;  %v1205_v28 = vld [vmem:[#allocation2 + $0x168] sm:$0xff] }
 0x13e   :  { %664 = vmatpush.bf16.msrb.mxu1 %v1206_v26 }
 0x142   :  { %665 = vmatpush.bf16.msrb.mxu1 %v1205_v28 }
 0x1aa   :  { %v276_v33 = vpop.f32.mrf.mxu1 }
 0x1ab   :  { %v277_v37 = vadd.f32 %v1228_v34, %v276_v33  ;;  %v1204_v33 = vld [vmem:[#allocation2 + $0x160] sm:$0xff] }
 0x1ac   :  { %666 = vmatpush.bf16.msrb.mxu1 %v1204_v33 }
 0x1ad   :  { %v286_v40 = vmul.f32 0.2, %v277_v37 }
 0x1af   :  { %v290_v44 = vmax.f32 %v277_v37, %v286_v40 }
 0x1b2   :  { %v278_v39 = vpop.f32.mrf.mxu1 }
 0x1b3   :  { %v279_v41 = vadd.f32 %v1228_v34, %v278_v39 }
 0x1b5   :  { %v287_v42 = vmul.f32 0.2, %v279_v41 }
 0x1b7   :  { %v291_v45 = vmax.f32 %v279_v41, %v287_v42 }
 0x1b9   :  { %v313_v46 = vpack.c.bf16 %v291_v45, %v290_v44 }
 0x1ba   :  { %v281_v47 = vpop.f32.mrf.mxu1 }
 0x1bb   :  { %374 = vmatmul.bf16.vlgmr.msra.gmra.mxu2 %v313_v46  ;;  %v282_v48 = vadd.f32 %v1228_v34, %v281_v47  ;;  %v1203_v46 = vld [vmem:[#allocation2 + $0x158] sm:$0xff]  ;;  %v1202_v47 = vld [vmem:[#allocation2 + $0x150] sm:$0xff] }
 0x1bc   :  { %667 = vmatpush.bf16.msrb.mxu1 %v1203_v46 }
 0x1bd   :  { %v288_v50 = vmul.f32 0.2, %v282_v48 }
 0x1bf   :  { %v292_v53 = vmax.f32 %v282_v48, %v288_v50  ;;  %v1201_v48 = vld [vmem:[#allocation2 + $0x148] sm:$0xff] }
 0x1c0   :  { %668 = vmatpush.bf16.msrb.mxu1 %v1202_v47 }
 0x1c2   :  { %v283_v49 = vpop.f32.mrf.mxu1 }
 0x1c3   :  { %v284_v51 = vadd.f32 %v1228_v34, %v283_v49  ;;  %v1200_v49 = vld [vmem:[#allocation2 + $0x140] sm:$0xff] }
 0x1c4   :  { %669 = vmatpush.bf16.msrb.mxu1 %v1201_v48 }
 0x1c5   :  { %v289_v52 = vmul.f32 0.2, %v284_v51 }
 0x1c7   :  { %v293_v54 = vmax.f32 %v284_v51, %v289_v52  ;;  %v1231_v51 = vld [vmem:[%s1365_s2 + $0x4] ss:$0 sm:$0xff]  ;;  %v1215_v52 = vld [vmem:[#allocation2 + $0x1b8] sm:$0xff] }
 0x1c8   :  { %670 = vmatpush.bf16.msrb.mxu1 %v1200_v49  ;;  %762 = vmatpush.bf16.msrb.mxu2 %v1215_v52 }
 0x1c9   :  { %v314_v55 = vpack.c.bf16 %v293_v54, %v292_v53  ;;  %v1214_v53 = vld [vmem:[#allocation2 + $0x1b0] sm:$0xff] }
 0x1cb   :  { %379 = vmatmul.bf16.gmra.mxu2 %v314_v55  ;;  %v1213_v55 = vld [vmem:[#allocation2 + $0x1a8] sm:$0xff] }
 0x1cc   :  { %763 = vmatpush.bf16.msrb.mxu2 %v1214_v53 }
 0x1d0   :  { %764 = vmatpush.bf16.msrb.mxu2 %v1213_v55 }
 0x23e   :  { %v375_v60 = vpop.f32.mrf.mxu2 }
 0x23f   :  { %v376_v1 = vadd.f32 %v1229_v61, %v375_v60  ;;  %v1212_v60 = vld [vmem:[#allocation2 + $0x1a0] sm:$0xff] }
 0x240   :  { %765 = vmatpush.bf16.msrb.mxu2 %v1212_v60 }
 0x241   :  { %v385_v5 = vmul.f32 0.2, %v376_v1 }
 0x243   :  { %v389_v9 = vmax.f32 %v376_v1, %v385_v5 }
 0x246   :  { %v377_v3 = vpop.f32.mrf.mxu2 }
 0x247   :  { %v378_v6 = vadd.f32 %v1229_v61, %v377_v3 }
 0x249   :  { %v386_v7 = vmul.f32 0.2, %v378_v6 }
 0x24b   :  { %v390_v10 = vmax.f32 %v378_v6, %v386_v7 }
 0x24d   :  { %v412_v4 = vpack.c.bf16 %v390_v10, %v389_v9 }
 0x24e   :  { %v380_v11 = vpop.f32.mrf.mxu2 }
 0x24f   :  { %473 = vmatmul.bf16.vlgmr.msra.gmra.mxu3 %v412_v4  ;;  %v381_v0 = vadd.f32 %v1229_v61, %v380_v11  ;;  %v1211_v4 = vld [vmem:[#allocation2 + $0x198] sm:$0xff]  ;;  %v1210_v11 = vld [vmem:[#allocation2 + $0x190] sm:$0xff] }
 0x250   :  { %766 = vmatpush.bf16.msrb.mxu2 %v1211_v4 }
 0x251   :  { %v387_v13 = vmul.f32 0.2, %v381_v0 }
 0x253   :  { %v391_v16 = vmax.f32 %v381_v0, %v387_v13  ;;  %v1209_v0 = vld [vmem:[#allocation2 + $0x188] sm:$0xff] }
 0x254   :  { %767 = vmatpush.bf16.msrb.mxu2 %v1210_v11 }
 0x256   :  { %v382_v12 = vpop.f32.mrf.mxu2 }
 0x257   :  { %v383_v14 = vadd.f32 %v1229_v61, %v382_v12  ;;  %v1208_v12 = vld [vmem:[#allocation2 + $0x180] sm:$0xff] }
 0x258   :  { %768 = vmatpush.bf16.msrb.mxu2 %v1209_v0 }
 0x259   :  { %v388_v15 = vmul.f32 0.2, %v383_v14 }
 0x25b   :  { %v392_v17 = vmax.f32 %v383_v14, %v388_v15  ;;  %v1232_v14 = vld [vmem:[%s1365_s2 + $0x5] ss:$0 sm:$0xff]  ;;  %v1223_v15 = vld [vmem:[#allocation2 + $0x1f8] sm:$0xff] }
 0x25c   :  { %769 = vmatpush.bf16.msrb.mxu2 %v1208_v12  ;;  %861 = vmatpush.bf16.msrb.mxu3 %v1223_v15 }
 0x25d   :  { %v413_v18 = vpack.c.bf16 %v392_v17, %v391_v16  ;;  %v1222_v16 = vld [vmem:[#allocation2 + $0x1f0] sm:$0xff] }
 0x25f   :  { %478 = vmatmul.bf16.gmra.mxu3 %v413_v18  ;;  %v1221_v18 = vld [vmem:[#allocation2 + $0x1e8] sm:$0xff] }
 0x260   :  { %862 = vmatpush.bf16.msrb.mxu3 %v1222_v16 }
 0x264   :  { %863 = vmatpush.bf16.msrb.mxu3 %v1221_v18 }
 0x2d2   :  { %v474_v23 = vpop.f32.mrf.mxu3 }
 0x2d3   :  { %v475_v27 = vadd.f32 %v1230_v24, %v474_v23  ;;  %v1220_v23 = vld [vmem:[#allocation2 + $0x1e0] sm:$0xff] }
 0x2d4   :  { %864 = vmatpush.bf16.msrb.mxu3 %v1220_v23 }
 0x2d5   :  { %v484_v30 = vmul.f32 0.2, %v475_v27 }
 0x2d7   :  { %v488_v34 = vmax.f32 %v475_v27, %v484_v30 }
 0x2da   :  { %v476_v29 = vpop.f32.mrf.mxu3 }
 0x2db   :  { %v477_v31 = vadd.f32 %v1230_v24, %v476_v29 }
 0x2dd   :  { %v485_v32 = vmul.f32 0.2, %v477_v31 }
 0x2df   :  { %v489_v35 = vmax.f32 %v477_v31, %v485_v32 }
 0x2e1   :  { %v511_v36 = vpack.c.bf16 %v489_v35, %v488_v34 }
 0x2e2   :  { %v479_v37 = vpop.f32.mrf.mxu3 }
 0x2e3   :  { %572 = vmatmul.bf16.vlgmr.msrb.gmra.mxu0 %v511_v36  ;;  %v480_v38 = vadd.f32 %v1230_v24, %v479_v37  ;;  %v1219_v36 = vld [vmem:[#allocation2 + $0x1d8] sm:$0xff]  ;;  %v1218_v37 = vld [vmem:[#allocation2 + $0x1d0] sm:$0xff] }
 0x2e4   :  { %865 = vmatpush.bf16.msrb.mxu3 %v1219_v36 }
 0x2e5   :  { %v486_v40 = vmul.f32 0.2, %v480_v38 }
 0x2e7   :  { %v490_v43 = vmax.f32 %v480_v38, %v486_v40  ;;  %v1217_v38 = vld [vmem:[#allocation2 + $0x1c8] sm:$0xff] }
 0x2e8   :  { %866 = vmatpush.bf16.msrb.mxu3 %v1218_v37 }
 0x2ea   :  { %v481_v39 = vpop.f32.mrf.mxu3 }
 0x2eb   :  { %v482_v41 = vadd.f32 %v1230_v24, %v481_v39  ;;  %v1216_v39 = vld [vmem:[#allocation2 + $0x1c0] sm:$0xff] }
 0x2ec   :  { %867 = vmatpush.bf16.msrb.mxu3 %v1217_v38 }
 0x2ed   :  { %v487_v42 = vmul.f32 0.2, %v482_v41 }
 0x2ef   :  { %v491_v44 = vmax.f32 %v482_v41, %v487_v42  ;;  %v1233_v41 = vld [vmem:[%s1365_s2 + $0x6] ss:$0 sm:$0xff] }
 0x2f0   :  { %868 = vmatpush.bf16.msrb.mxu3 %v1216_v39 }
 0x2f1   :  { %v512_v45 = vpack.c.bf16 %v491_v44, %v490_v43 }
 0x2f3   :  { %577 = vmatmul.bf16.gmra.mxu0 %v512_v45 }
 0x360   :  { %v573_v50 = vpop.f32.mrf.mxu0 }
 0x361   :  { %v574_v54 = vadd.f32 %v1231_v51, %v573_v50 }
 0x363   :  { %v583_v57 = vmul.f32 0.2, %v574_v54 }
 0x365   :  { %v587_v61 = vmax.f32 %v574_v54, %v583_v57 }
 0x368   :  { %v575_v56 = vpop.f32.mrf.mxu0 }
 0x369   :  { %v576_v58 = vadd.f32 %v1231_v51, %v575_v56 }
 0x36b   :  { %v584_v59 = vmul.f32 0.2, %v576_v58 }
 0x36d   :  { %v588_v62 = vmax.f32 %v576_v58, %v584_v59  ;;  %v1234_v59 = vld [vmem:[%s1365_s2 + $0x7] ss:$0 sm:$0xff] }
 0x36f   :  { %v610_v63 = vpack.c.bf16 %v588_v62, %v587_v61 }
 0x370   :  { %v578_v1 = vpop.f32.mrf.mxu0 }
 0x371   :  { %671 = vmatmul.bf16.vlgmr.msrb.gmra.mxu1 %v610_v63  ;;  %v579_v2 = vadd.f32 %v1231_v51, %v578_v1 }
 0x373   :  { %v585_v5 = vmul.f32 0.2, %v579_v2 }
 0x375   :  { %v589_v8 = vmax.f32 %v579_v2, %v585_v5 }
 0x378   :  { %v580_v3 = vpop.f32.mrf.mxu0 }
 0x379   :  { %v581_v6 = vadd.f32 %v1231_v51, %v580_v3 }
 0x37b   :  { %v586_v7 = vmul.f32 0.2, %v581_v6 }
 0x37d   :  { %v590_v9 = vmax.f32 %v581_v6, %v586_v7 }
 0x37f   :  { %v611_v10 = vpack.c.bf16 %v590_v9, %v589_v8 }
 0x381   :  { %676 = vmatmul.bf16.gmra.mxu1 %v611_v10 }
 0x3ee   :  { %v672_v13 = vpop.f32.mrf.mxu1 }
 0x3ef   :  { %v673_v17 = vadd.f32 %v1232_v14, %v672_v13 }
 0x3f1   :  { %v682_v20 = vmul.f32 0.2, %v673_v17 }
 0x3f3   :  { %v686_v24 = vmax.f32 %v673_v17, %v682_v20 }
 0x3f6   :  { %v674_v19 = vpop.f32.mrf.mxu1 }
 0x3f7   :  { %v675_v21 = vadd.f32 %v1232_v14, %v674_v19 }
 0x3f9   :  { %v683_v22 = vmul.f32 0.2, %v675_v21 }
 0x3fb   :  { %v687_v25 = vmax.f32 %v675_v21, %v683_v22 }
 0x3fd   :  { %v709_v26 = vpack.c.bf16 %v687_v25, %v686_v24 }
 0x3fe   :  { %v677_v27 = vpop.f32.mrf.mxu1 }
 0x3ff   :  { %770 = vmatmul.bf16.vlgmr.msrb.gmra.mxu2 %v709_v26  ;;  %v678_v28 = vadd.f32 %v1232_v14, %v677_v27 }
 0x401   :  { %v684_v30 = vmul.f32 0.2, %v678_v28 }
 0x403   :  { %v688_v33 = vmax.f32 %v678_v28, %v684_v30 }
 0x406   :  { %v679_v29 = vpop.f32.mrf.mxu1 }
 0x407   :  { %v680_v31 = vadd.f32 %v1232_v14, %v679_v29 }
 0x409   :  { %v685_v32 = vmul.f32 0.2, %v680_v31 }
 0x40b   :  { %v689_v34 = vmax.f32 %v680_v31, %v685_v32 }
 0x40d   :  { %v710_v35 = vpack.c.bf16 %v689_v34, %v688_v33 }
 0x40f   :  { %775 = vmatmul.bf16.gmra.mxu2 %v710_v35 }
 0x482   :  { %v771_v40 = vpop.f32.mrf.mxu2 }
 0x483   :  { %v772_v42 = vadd.f32 %v1233_v41, %v771_v40 }
 0x485   :  { %v781_v44 = vmul.f32 0.2, %v772_v42 }
 0x487   :  { %v785_v47 = vmax.f32 %v772_v42, %v781_v44 }
 0x48a   :  { %v773_v43 = vpop.f32.mrf.mxu2 }
 0x48b   :  { %v774_v45 = vadd.f32 %v1233_v41, %v773_v43 }
 0x48d   :  { %v782_v46 = vmul.f32 0.2, %v774_v45 }
 0x48f   :  { %v786_v48 = vmax.f32 %v774_v45, %v782_v46 }
 0x491   :  { %v808_v49 = vpack.c.bf16 %v786_v48, %v785_v47 }
 0x492   :  { %v776_v50 = vpop.f32.mrf.mxu2 }
 0x493   :  { %869 = vmatmul.bf16.vlgmr.msrb.gmra.mxu3 %v808_v49  ;;  %v777_v51 = vadd.f32 %v1233_v41, %v776_v50 }
 0x495   :  { %v783_v53 = vmul.f32 0.2, %v777_v51 }
 0x497   :  { %v787_v56 = vmax.f32 %v777_v51, %v783_v53 }
 0x49a   :  { %v778_v52 = vpop.f32.mrf.mxu2 }
 0x49b   :  { %v779_v54 = vadd.f32 %v1233_v41, %v778_v52 }
 0x49d   :  { %v784_v55 = vmul.f32 0.2, %v779_v54 }
 0x49f   :  { %v788_v57 = vmax.f32 %v779_v54, %v784_v55 }
 0x4a1   :  { %v809_v58 = vpack.c.bf16 %v788_v57, %v787_v56 }
 0x4a3   :  { %874 = vmatmul.bf16.gmra.mxu3 %v809_v58 }
 0x516   :  { %v870_v60 = vpop.f32.mrf.mxu3 }
 0x517   :  { %v871_v61 = vadd.f32 %v1234_v59, %v870_v60 }
 0x519   :  { %v880_v62 = vmul.f32 0.2, %v871_v61 }
 0x51b   :  { %v884_v63 = vmax.f32 %v871_v61, %v880_v62 }
 0x51d   :  { %888 = vst [vmem:[%s1366_s3] sm:$0xff] %v884_v63 }
 0x51e   :  { %v872_v1 = vpop.f32.mrf.mxu3 }
 0x51f   :  { %v873_v2 = vadd.f32 %v1234_v59, %v872_v1 }
 0x521   :  { %v881_v3 = vmul.f32 0.2, %v873_v2 }
 0x523   :  { %v885_v5 = vmax.f32 %v873_v2, %v881_v3 }
 0x525   :  { %889 = vst [vmem:[%s1366_s3 + $0x8] sm:$0xff] %v885_v5 }
 0x526   :  { %v875_v6 = vpop.f32.mrf.mxu3 }
 0x527   :  { %v876_v7 = vadd.f32 %v1234_v59, %v875_v6 }
 0x529   :  { %v882_v8 = vmul.f32 0.2, %v876_v7 }
 0x52b   :  { %v886_v9 = vmax.f32 %v876_v7, %v882_v8 }
 0x52d   :  { %890 = vst [vmem:[%s1366_s3 + $0x10] sm:$0xff] %v886_v9 }
 0x52e   :  { %v877_v10 = vpop.f32.mrf.mxu3 }
 0x52f   :  { %v878_v4 = vadd.f32 %v1234_v59, %v877_v10 }
 0x531   :  { %v883_v11 = vmul.f32 0.2, %v878_v4 }
 0x533   :  { %v887_v0 = vmax.f32 %v878_v4, %v883_v11 }
 0x535   :  { %891 = vst [vmem:[%s1366_s3 + $0x18] sm:$0xff] %v887_v0 }
 0x536   :  { %896 = vsyncpa [#allocation3], 1 }

</bundles_post_ra>
